<compile_context>
chip_gen: v6e
topology: v6e:2x2x1
jax: 0.10.0
libtpu: 0.0.40
codegen_flags: <defaults>
</compile_context>

<pallas_src>
import jax
import jax.numpy as jnp
from jax.experimental import pallas as pl
from jax.experimental.pallas import tpu as pltpu

_HIGHEST = jax.lax.Precision.HIGHEST
_LAYER_DIMS = (1024, 128, 64, 16, 1)


# ---------------------------------------------------------------------------
# BlockSpec helpers
# ---------------------------------------------------------------------------
def _const_block(i):
    return (0, 0)


def _spec(shape, index_map, buffers=None):
    """BlockSpec with an optional explicit buffer count (falls back to the
    default pipeline if this JAX version's BlockSpec lacks pipeline_mode)."""
    if buffers is not None:
        try:
            return pl.BlockSpec(shape, index_map,
                                pipeline_mode=pl.Buffered(buffers))
        except TypeError:
            pass
    return pl.BlockSpec(shape, index_map)


def _const_spec(shape):
    """Block revisited every grid step: DMA'd once, single-buffered (no point
    double-buffering a block whose index never changes)."""
    return _spec(shape, _const_block, buffers=1)


# ---------------------------------------------------------------------------
# Kernels
# ---------------------------------------------------------------------------
def rator_chain_kernel(x_ref, w1_ref, b1_ref, wt_ref, bt_ref, o_ref):
    """Layer 1 on the MXU; layers 2..5 pre-folded into a [1, 1024] VPU tail."""
    w1 = w1_ref[...]
    # Single cast of x to the weight dtype (bf16 by default) -> homogeneous
    # MXU matmul with f32 accumulation.
    h = jnp.dot(x_ref[...].astype(w1.dtype), w1,
                preferred_element_type=jnp.float32)
    h = h + b1_ref[...].astype(jnp.float32)                  # [tb, 1024]
    # Folded 1024 -> 1 tail on the VPU (broadcast-mul + lane reduce); an MXU
    # pass here would use a handful of the 128/256 result columns and pay full
    # weight-push + drain latency per tile.
    wt = wt_ref[...].astype(jnp.float32)                     # [1, 1024]
    out = jnp.sum(h * wt, axis=-1, keepdims=True) + bt_ref[0, 0]
    o_ref[...] = out.astype(o_ref.dtype)


def rator_collapsed_kernel(x_ref, w_ref, b_ref, o_ref):
    """Fully collapsed network: out = x @ W_eff + b_eff, evaluated as a VPU
    broadcast-multiply + lane-reduce (W_eff is passed as a [1, D] row)."""
    x = x_ref[...].astype(jnp.float32)
    w = w_ref[...].astype(jnp.float32)                       # [1, D]
    out = jnp.sum(x * w, axis=-1, keepdims=True) + b_ref[0, 0]
    o_ref[...] = out.astype(o_ref.dtype)


# ---------------------------------------------------------------------------
# Trace-time parameter folding (outside the kernel, HIGHEST precision)
# ---------------------------------------------------------------------------
def fold_affine(params):
    """Exactly fold a chain of affine layers (no nonlinearities / inference
    dropout between them) into a single (W, b)."""
    w_eff, b_eff = params[0]
    for (w, b) in params[1:]:
        w_eff = jnp.dot(w_eff, w, precision=_HIGHEST)
        b_eff = jnp.dot(b_eff, w, precision=_HIGHEST) + b
    return w_eff, b_eff


def _default_tile_b(batch):
    """Batch tile: biggest of (1024, 512, 256, 128) that divides the batch,
    preferring >= 2 tiles and an even tile count (v7x two-TC balance via the
    'parallel' grid axis). Larger tiles amortize per-grid-step overhead on
    the HBM-bound collapsed path."""
    candidates = (1024, 512, 256, 128)
    for t in candidates:                       # pass 1: even number of tiles
        n = batch // t
        if batch % t == 0 and n >= 2 and n % 2 == 0:
            return t
    for t in candidates:                       # pass 2: any >= 2 tiles
        if batch % t == 0 and batch // t >= 2:
            return t
    return batch


# ---------------------------------------------------------------------------
# Forward wrapper
# ---------------------------------------------------------------------------
def rator_forward(x, params, *, collapse=True, weight_dtype=None,
                  x_dtype=None, tile_b=None, x_buffers=None):
    """Forward pass of `Rator.single_inference`.

    x        : [B, input_size] float array.
    params   : list of 5 (W, b) pairs, W [in, out], b [1, out].
    collapse : fold the whole stack into one affine map (default, fastest).
    weight_dtype : chain-path layer-1 weight dtype (default bf16).
    x_dtype  : optional dtype to cast x to at the call boundary (e.g. bf16
               halves the HBM-bound x stream; accumulation stays f32).
    x_buffers: optional pipeline depth for the x BlockSpec (default pipeline
               if None); sweep 2 vs 3 on v5e if DMA issue jitter shows.
    """
    batch, d_in = x.shape
    assert params[0][0].shape[0] == d_in
    out_dtype = x.dtype

    if x_dtype is not None:
        x = x.astype(x_dtype)

    if tile_b is None:
        tile_b = _default_tile_b(batch)
    if tile_b != batch:
        # (8, 128) sublane rule: a partial batch block must be a multiple of 8.
        assert batch % tile_b == 0 and tile_b % 8 == 0, (batch, tile_b)
    num_tiles = batch // tile_b

    x_spec = _spec((tile_b, d_in), lambda i: (i, 0), buffers=x_buffers)
    out_spec = pl.BlockSpec((tile_b, 1), lambda i: (i, 0))
    out_shape = jax.ShapeDtypeStruct((batch, 1), out_dtype)
    smem_spec = pl.BlockSpec(memory_space=pltpu.MemorySpace.SMEM)

    if collapse:
        w_eff, b_eff = fold_affine(params)       # [D, 1], [1, 1]
        operands = (x,
                    w_eff.reshape(1, d_in).astype(jnp.float32),
                    b_eff.reshape(1, 1).astype(jnp.float32))
        in_specs = [x_spec, _const_spec((1, d_in)), smem_spec]
        kernel = rator_collapsed_kernel
        flops = 2 * batch * d_in
        interm_bytes = 0
    else:
        if weight_dtype is None:
            # DEFAULT MXU precision already runs bf16 operand passes, so f32
            # weights buy no accuracy but double W1 DMA + VMEM.
            weight_dtype = jnp.bfloat16
        w1, b1 = params[0]
        w_tail, b_tail = fold_affine(params[1:])  # [1024, 1], [1, 1]
        operands = (x,
                    w1.astype(weight_dtype),
                    b1.reshape(1, -1).astype(jnp.float32),
                    w_tail.reshape(1, -1).astype(jnp.float32),
                    b_tail.reshape(1, 1).astype(jnp.float32))
        in_specs = [x_spec,
                    _const_spec(w1.shape),
                    _const_spec((1, w1.shape[1])),
                    _const_spec((1, w_tail.shape[0])),
                    smem_spec]
        kernel = rator_chain_kernel
        flops = 2 * batch * (d_in * 1024 + 1024)
        interm_bytes = tile_b * 1024 * 4          # [tile_b, 1024] f32 live

    param_bytes = sum(int(a.size) * a.dtype.itemsize for a in operands[1:])
    x_tile_bytes = tile_b * d_in * x.dtype.itemsize
    bytes_accessed = int(x.size) * x.dtype.itemsize + param_bytes + batch * 4

    # VMEM budget: x-tile buffers + (single-buffered) weight set, with slack
    # for the largest live intermediate and the output; capped by a
    # generation-aware ceiling from the actual chip's VMEM capacity.
    n_x_buf = x_buffers if x_buffers is not None else 2
    need = int(n_x_buf * x_tile_bytes + 2 * param_bytes + 3 * interm_bytes
               + 2 * tile_b * 4 + (8 << 20))
    try:
        vmem_cap = int(pltpu.get_tpu_info().vmem_capacity_bytes)
    except Exception:
        vmem_cap = 64 << 20                       # conservative (v7x per-TC)
    ceiling = min(int(vmem_cap * 0.9), 112 << 20)
    vmem_limit = min(max(need, 32 << 20), ceiling)

    grid_spec = pltpu.PrefetchScalarGridSpec(
        num_scalar_prefetch=0,
        grid=(num_tiles,),
        in_specs=in_specs,
        out_specs=out_spec,
    )

    return pl.pallas_call(
        kernel,
        out_shape=out_shape,
        grid_spec=grid_spec,
        compiler_params=pltpu.CompilerParams(
            dimension_semantics=("parallel",),
            vmem_limit_bytes=int(vmem_limit)),
        cost_estimate=pl.CostEstimate(
            flops=int(flops), transcendentals=0,
            bytes_accessed=int(bytes_accessed)),
    )(*operands)


# ---------------------------------------------------------------------------
# Test harness
# ---------------------------------------------------------------------------
def init_params(key, input_size):
    """Deterministic synthetic params matching the nn.Linear shapes."""
    dims = (input_size,) + _LAYER_DIMS
    params = []
    for li, (din, dout) in enumerate(zip(dims[:-1], dims[1:])):
        kw, kb, key = jax.random.split(jax.random.fold_in(key, li), 3)
        bound = 1.0 / (din ** 0.5)           # PyTorch Linear default init range
        w = jax.random.uniform(kw, (din, dout), jnp.float32, -bound, bound)
        b = jax.random.uniform(kb, (1, dout), jnp.float32, -bound, bound)
        params.append((w, b))
    return params


def reference_forward(x, params):
    """Pure-JAX reference at HIGHEST matmul precision (near-exact f32)."""
    h = x
    for (w, b) in params:
        h = jnp.dot(h, w, precision=_HIGHEST) + b
    return h


if __name__ == "__main__":
    key = jax.random.PRNGKey(0)
    kx, kp = jax.random.split(key)

    input_size = 64                          # small cfg.input_size for the test
    params = init_params(kp, input_size)

    checks = []

    # Small batch (single grid step).
    x_small = jax.random.normal(kx, (8, input_size), jnp.float32)
    ref_small = reference_forward(x_small, params)

    out = jax.block_until_ready(rator_forward(x_small, params, collapse=True))
    checks.append(("collapsed/B=8", out, ref_small, 1e-3))

    out = jax.block_until_ready(
        rator_forward(x_small, params, collapse=True, x_dtype=jnp.bfloat16))
    checks.append(("collapsed/B=8/x-bf16", out, ref_small, 5e-2))

    out = jax.block_until_ready(rator_forward(x_small, params, collapse=False))
    checks.append(("chain/B=8/bf16-w", out, ref_small, 5e-2))

    out = jax.block_until_ready(
        rator_forward(x_small, params, collapse=False,
                      weight_dtype=jnp.float32))
    checks.append(("chain/B=8/f32-w", out, ref_small, 5e-3))

    # Larger batch: exercises batch tiling (tile_b=256, grid=2, even tile
    # count -> both v7x TensorCores get work).
    x_big = jax.random.normal(jax.random.fold_in(kx, 1),
                              (512, input_size), jnp.float32)
    ref_big = reference_forward(x_big, params)

    out = jax.block_until_ready(rator_forward(x_big, params, collapse=True))
    checks.append(("collapsed/B=512", out, ref_big, 1e-3))

    out = jax.block_until_ready(rator_forward(x_big, params, collapse=False))
    checks.append(("chain/B=512/bf16-w", out, ref_big, 5e-2))

    for name, got, want, tol in checks:
        assert got.shape == want.shape, f"shape mismatch: {name}"
        assert jnp.allclose(got, want, atol=tol, rtol=tol), f"mismatch: {name}"

    # TODO(synk): train-mode Dropout masking and the cal_loss/cal_metric
    # branches (MSE, Pearson/Spearman) are host-side utilities, not kernels.
    print("KERNEL_OK")
</pallas_src>

<mosaic_0001>
module attributes {stable_mosaic.version = 11 : i64} {
  func.func @rator_collapsed_kernel(%arg0: i32, %arg1: memref<8x64xf32, #tpu.memory_space<vmem>>, %arg2: memref<1x64xf32, #tpu.memory_space<vmem>>, %arg3: memref<1x1xf32, #tpu.memory_space<smem>>, %arg4: memref<8x1xf32, #tpu.memory_space<vmem>>) attributes {dimension_semantics = [#tpu.dimension_semantics<parallel>], iteration_bounds = array<i64: 1>, scalar_prefetch = 0 : i64, scratch_operands = 0 : i64, tpu.core_type = #tpu.core_type<tc>, window_params = [{transform_indices = @transform_0, window_bounds = array<i64: 8, 64>}, {pipeline_mode = #tpu.pipeline_mode<synchronous>, transform_indices = @transform_1, window_bounds = array<i64: 1, 64>}, {transform_indices = @transform_2, window_bounds = array<i64: 1, 1>}, {transform_indices = @transform_3, window_bounds = array<i64: 8, 1>}]} {
    %c0 = arith.constant 0 : index
    %c0_0 = arith.constant 0 : index
    %0 = vector.load %arg1[%c0, %c0_0] : memref<8x64xf32, #tpu.memory_space<vmem>>, vector<8x64xf32>
    %c0_1 = arith.constant 0 : index
    %c0_2 = arith.constant 0 : index
    %1 = vector.load %arg2[%c0_1, %c0_2] : memref<1x64xf32, #tpu.memory_space<vmem>>, vector<1x64xf32>
    %2 = vector.broadcast %1 : vector<1x64xf32> to vector<8x64xf32>
    %3 = arith.mulf %0, %2 : vector<8x64xf32>
    %cst = arith.constant dense<0.000000e+00> : vector<8xf32>
    %4 = vector.multi_reduction <add>, %3, %cst [1] : vector<8x64xf32> to vector<8xf32>
    %5 = vector.shape_cast %4 : vector<8xf32> to vector<8x1xf32>
    %c0_3 = arith.constant 0 : index
    %c0_4 = arith.constant 0 : index
    %6 = memref.load %arg3[%c0_3, %c0_4] : memref<1x1xf32, #tpu.memory_space<smem>>
    %7 = vector.broadcast %6 : f32 to vector<8x1xf32>
    %8 = arith.addf %5, %7 : vector<8x1xf32>
    %c0_5 = arith.constant 0 : index
    %c0_6 = arith.constant 0 : index
    %9 = vector.load %arg4[%c0_5, %c0_6] : memref<8x1xf32, #tpu.memory_space<vmem>>, vector<8x1xf32>
    tpu.vector_store %arg4[%c0_5, %c0_6], %8 {strides = array<i32>} : memref<8x1xf32, #tpu.memory_space<vmem>>, vector<8x1xf32>,
    return
  }
  func.func @transform_0(%arg0: i32) -> (i32, i32) {
    %c0_i32 = arith.constant 0 : i32
    %c0_i32_0 = arith.constant 0 : i32
    return %arg0, %c0_i32 : i32, i32
  }
  func.func @transform_1(%arg0: i32) -> (i32, i32) {
    %c0_i32 = arith.constant 0 : i32
    %c0_i32_0 = arith.constant 0 : i32
    %c0_i32_1 = arith.constant 0 : i32
    return %c0_i32, %c0_i32_0 : i32, i32
  }
  func.func @transform_2(%arg0: i32) -> (i32, i32) {
    %c0_i32 = arith.constant 0 : i32
    %c0_i32_0 = arith.constant 0 : i32
    %c0_i32_1 = arith.constant 0 : i32
    return %c0_i32, %c0_i32_0 : i32, i32
  }
  func.func @transform_3(%arg0: i32) -> (i32, i32) {
    %c0_i32 = arith.constant 0 : i32
    %c0_i32_0 = arith.constant 0 : i32
    return %arg0, %c0_i32 : i32, i32
  }
}

</mosaic_0001>

<bundles_post_ra>
// kernel: tpu_custom_call.1
= control target key start
LH: loop header
LB: loop body
LE: loop exit
PB: predicated region body
PF: predicated region fallthrough
CT: control target
= control target key end

     0   :  { %9 = vsyncpa [#allocation4], 0  ;;  %s74_s12 = smov [#allocation3]   ;;  %s107_s0 = inlined_call_operand.hbm [shape: f32[8,64], index: 0, kind: input, shape index: {}]   ;;  %s108_s1 = inlined_call_operand.vmem [shape: f32[1,64], index: 1, kind: input, shape index: {}]   ;;  %s109_s2 = inlined_call_operand.<no memory space> [shape: f32[1,1], index: 2, kind: input, shape index: {}]   ;;  %s110_s3 = inlined_call_operand.vmem [shape: f32[8,1], index: 3, kind: output, shape index: {}]  }
   0x1   :  { %s16_s13 = sshll.u32 %s74_s12, 4  ;;  %s17_s13 = int_to_ptr.vmem [resolvable:$true] %s16_s13 }
   0x2   :  { %s60_s14 = scalar_lea.vmem %s17_s13, 128  ;;  %p65_p1 = scmp.lt.s32.totalorder %s17_s13, %s17_s13 }
   0x3   :  { %p61_p0 = scmp.ne.s32.totalorder %s17_s13, %s60_s14  ;;  %p66_p2 = scmp.lt.s32.totalorder %s60_s14, %s60_s14 }
   0x5   :  { %p67_p3 = por %p66_p2, %p65_p1 }
   0x7   :  { %p68_p4 = pnand %p67_p3, %p61_p0 }
   0x9   :  { %71 = shalt.err (!%p68_p4)
}
   0xa   :  { %19 = dma.hbm_to_vmem [thread:$0]  %s107_s0, 128, %s17_s13, [#allocation4]  }
   0xb   :  { %72 = dma.done.wait [#allocation4], 128  }
   0xc   :  { %73 = vsyncadd [#allocation4], 4294967168  ;;  %v27_v0 = vld [vmem:[#allocation3] sm:$0xff]  ;;  %vm36_vm0 = vcmask 523264   ;;  %v41_v4 = vstv %s109_s2  ;;  %vm43_vm1 = vcmask 7168  }
   0xd   :  { %v50_v1 = vld [vmem:[%s108_s1] ss:$0 sm:$0xff] }
   0xe   :  { %v35_v2 = vmul.f32 %v50_v1, %v27_v0 }
  0x10   :  { %v37_v3 = vsel %vm36_vm0, %v35_v2, 0.0 }
  0x11   :  { %38 = vadd.xlane.f32.xlu0 %v37_v3 }
  0x9a   :  { %v39_v5 = vpop.xlane.xlu0 %38 }
  0x9b   :  { %v42_v6 = vadd.f32 %v41_v4, %v39_v5 }
  0x9d   :  { %44 = vst.msk [vmem:[%s110_s3] sm:$0xff] %vm43_vm1, %v42_v6 }
  0x9e   :  { %49 = vsyncpa [#allocation4], 1 }

</bundles_post_ra>
